<compile_context>
chip_gen: v6e
topology: v6e:2x2x1
jax: 0.10.0
libtpu: 0.0.40
codegen_flags: <defaults>
</compile_context>

<pallas_src>
import jax
import jax.numpy as jnp
from jax.experimental import pallas as pl
from jax.experimental.pallas import tpu as pltpu


ROW_ALIGN = 16      # multiple of the bf16 sublane tile (16); also valid for f32 (8)


def _round_up(x, m):
    return ((x + m - 1) // m) * m


def _mlp_kernel(x_ref, w1_ref, b1_ref, w2_ref, b2_ref, o_ref):
    # Biases read once per grid step (f32).
    b1 = b1_ref[...]                                   # (1, D_h)
    b2 = b2_ref[...]                                   # (1, D_out)
    # fc1: x @ W1 (bf16 operands, f32 accumulate on the MXU), bias + ReLU in f32.
    h = jnp.dot(x_ref[...], w1_ref[...], preferred_element_type=jnp.float32)
    h = jnp.maximum(h + b1, 0.0)
    # fc2: downcast hidden activations to the weight dtype, f32 accumulate.
    o = jnp.dot(h.astype(w2_ref.dtype), w2_ref[...],
                preferred_element_type=jnp.float32)
    # Narrow store: only D_out columns ever reach HBM.
    o_ref[...] = (o + b2).astype(o_ref.dtype)


def prepare_params(w1, b1, w2, b2, *, weight_dtype=jnp.bfloat16):
    """One-time (init-time) parameter prep: bf16 weights (halved HBM reads,
    doubled MXU rate on v6e/v7x), f32 row-vector biases (bias/ReLU stay f32)."""
    return (w1.astype(weight_dtype),
            b1.reshape(1, -1).astype(jnp.float32),
            w2.astype(weight_dtype),
            b2.reshape(1, -1).astype(jnp.float32))


def permutation_invariant_net(x, w1, b1, w2, b2, *, row_tile=4096):
    """fc1 -> ReLU -> fc2 for x: (B, N, D_in) -> (B, N, D_out). Weights are (in, out)."""
    B, N, D_in = x.shape
    D_h = w1.shape[1]
    D_out = w2.shape[1]
    M = B * N

    compute_dtype = w1.dtype
    # In the full GNN, edge_attr would already arrive in compute_dtype -> no-op cast.
    x2d = x.reshape(M, D_in).astype(compute_dtype)
    b1 = b1.reshape(1, D_h)
    b2 = b2.reshape(1, D_out)

    # Row tile: as large as practical, but capped so there are >=2 grid steps
    # whenever M allows it (v7x megacore sharding); ROW_ALIGN-aligned; x is NOT
    # padded -- the final partial block's OOB rows are discarded by Pallas.
    tm = max(ROW_ALIGN, min(_round_up(row_tile, ROW_ALIGN),
                            _round_up(pl.cdiv(M, 2), ROW_ALIGN)))
    grid_m = pl.cdiv(M, tm)

    w_item = jnp.dtype(compute_dtype).itemsize
    cost = pl.CostEstimate(
        flops=2 * M * (D_in * D_h + D_h * D_out),
        transcendentals=0,
        bytes_accessed=(w_item * (M * D_in + M * D_out + D_in * D_h + D_h * D_out)
                        + 4 * (D_h + D_out)),
    )

    out2d = pl.pallas_call(
        _mlp_kernel,
        out_shape=jax.ShapeDtypeStruct((M, D_out), compute_dtype),
        grid=(grid_m,),
        in_specs=[
            pl.BlockSpec((tm, D_in), lambda i: (i, 0)),     # x tile: pipelined
            pl.BlockSpec((D_in, D_h), lambda i: (0, 0)),    # weights/biases VMEM-resident
            pl.BlockSpec((1, D_h), lambda i: (0, 0)),
            pl.BlockSpec((D_h, D_out), lambda i: (0, 0)),
            pl.BlockSpec((1, D_out), lambda i: (0, 0)),
        ],
        out_specs=pl.BlockSpec((tm, D_out), lambda i: (i, 0)),   # narrow writeback
        compiler_params=pltpu.CompilerParams(
            dimension_semantics=("parallel",),              # shard row tiles across TCs
        ),
        cost_estimate=cost,
    )(x2d, w1, b1, w2, b2)

    # Pure reshape -- no slicing / padded-array pass.
    return out2d.reshape(B, N, D_out)


def init_params(key, input_dim, hidden_dim, output_dim, dtype=jnp.float32):
    """Deterministic init mirroring nn.Linear shapes (stored transposed: (in, out))."""
    k1, k2, k3, k4, k5, k6 = jax.random.split(key, 6)
    lim1 = 1.0 / (input_dim ** 0.5)
    lim2 = 1.0 / (hidden_dim ** 0.5)
    lim3 = 1.0 / (output_dim ** 0.5)
    w1 = jax.random.uniform(k1, (input_dim, hidden_dim), dtype, -lim1, lim1)
    b1 = jax.random.uniform(k2, (hidden_dim,), dtype, -lim1, lim1)
    w2 = jax.random.uniform(k3, (hidden_dim, output_dim), dtype, -lim2, lim2)
    b2 = jax.random.uniform(k4, (output_dim,), dtype, -lim2, lim2)
    # fc_stats: initialized (as in the PyTorch __init__) but unused in forward.
    w_stats = jax.random.uniform(k5, (output_dim, output_dim), dtype, -lim3, lim3)
    b_stats = jax.random.uniform(k6, (output_dim,), dtype, -lim3, lim3)
    return w1, b1, w2, b2, w_stats, b_stats


def _reference(x, w1_c, b1_c, w2_c, b2_c):
    """Pure-JAX reference with the same bf16 storage / f32 accumulation."""
    xf = x.astype(w1_c.dtype).astype(jnp.float32)
    h = jnp.maximum(xf @ w1_c.astype(jnp.float32) + b1_c, 0.0)
    h = h.astype(w2_c.dtype).astype(jnp.float32)
    o = h @ w2_c.astype(jnp.float32) + b2_c
    return o.astype(w1_c.dtype)


if __name__ == "__main__":
    key = jax.random.PRNGKey(0)
    # edge_attr is (num_edges, num_layouts); treated here as (batch, set_size, input_dim).
    batch, set_size = 2, 8
    input_dim, hidden_dim, output_dim = 16, 32, 8   # num_layouts, hidden_channels, edge_dims

    kx, kp = jax.random.split(key)
    x = jax.random.normal(kx, (batch, set_size, input_dim), dtype=jnp.float32)
    w1, b1, w2, b2, _, _ = init_params(kp, input_dim, hidden_dim, output_dim)

    # Init-time (hoisted) parameter prep: bf16 weights, f32 biases.
    w1_c, b1_c, w2_c, b2_c = prepare_params(w1, b1, w2, b2)

    out = jax.block_until_ready(permutation_invariant_net(x, w1_c, b1_c, w2_c, b2_c))
    ref = _reference(x, w1_c, b1_c, w2_c, b2_c).reshape(batch, set_size, output_dim)
    assert out.shape == (batch, set_size, output_dim)
    assert jnp.allclose(out.astype(jnp.float32), ref.astype(jnp.float32),
                        atol=1e-2, rtol=1e-2)

    # Exercise the partial-last-block (M not a multiple of the row tile/8) path.
    x2 = jax.random.normal(jax.random.PRNGKey(1), (3, 5, input_dim), dtype=jnp.float32)
    out2 = jax.block_until_ready(permutation_invariant_net(x2, w1_c, b1_c, w2_c, b2_c))
    ref2 = _reference(x2, w1_c, b1_c, w2_c, b2_c).reshape(3, 5, output_dim)
    assert out2.shape == (3, 5, output_dim)
    assert jnp.allclose(out2.astype(jnp.float32), ref2.astype(jnp.float32),
                        atol=1e-2, rtol=1e-2)

    # TODO(synk): the surrounding GNN (GATv2Conv / TransformerConv / GPSConv,
    # global_add_pool, log_softmax) and the unused fc_stats layer are outside the
    # scope of this edge-MLP kernel.
    print("KERNEL_OK")
</pallas_src>

<mosaic_0001>
module attributes {stable_mosaic.version = 11 : i64} {
  func.func @_mlp_kernel(%arg0: i32, %arg1: memref<16x16xbf16, #tpu.memory_space<vmem>>, %arg2: memref<16x32xbf16, #tpu.memory_space<vmem>>, %arg3: memref<1x32xf32, #tpu.memory_space<vmem>>, %arg4: memref<32x8xbf16, #tpu.memory_space<vmem>>, %arg5: memref<1x8xf32, #tpu.memory_space<vmem>>, %arg6: memref<16x8xbf16, #tpu.memory_space<vmem>>) attributes {dimension_semantics = [#tpu.dimension_semantics<parallel>], iteration_bounds = array<i64: 1>, scalar_prefetch = 0 : i64, scratch_operands = 0 : i64, tpu.core_type = #tpu.core_type<tc>, window_params = [{transform_indices = @transform_0, window_bounds = array<i64: 16, 16>}, {pipeline_mode = #tpu.pipeline_mode<synchronous>, transform_indices = @transform_1, window_bounds = array<i64: 16, 32>}, {pipeline_mode = #tpu.pipeline_mode<synchronous>, transform_indices = @transform_2, window_bounds = array<i64: 1, 32>}, {pipeline_mode = #tpu.pipeline_mode<synchronous>, transform_indices = @transform_3, window_bounds = array<i64: 32, 8>}, {pipeline_mode = #tpu.pipeline_mode<synchronous>, transform_indices = @transform_4, window_bounds = array<i64: 1, 8>}, {transform_indices = @transform_5, window_bounds = array<i64: 16, 8>}]} {
    %c0 = arith.constant 0 : index
    %c0_0 = arith.constant 0 : index
    %0 = vector.load %arg3[%c0, %c0_0] : memref<1x32xf32, #tpu.memory_space<vmem>>, vector<1x32xf32>
    %c0_1 = arith.constant 0 : index
    %c0_2 = arith.constant 0 : index
    %1 = vector.load %arg5[%c0_1, %c0_2] : memref<1x8xf32, #tpu.memory_space<vmem>>, vector<1x8xf32>
    %c0_3 = arith.constant 0 : index
    %c0_4 = arith.constant 0 : index
    %2 = vector.load %arg1[%c0_3, %c0_4] : memref<16x16xbf16, #tpu.memory_space<vmem>>, vector<16x16xbf16>
    %c0_5 = arith.constant 0 : index
    %c0_6 = arith.constant 0 : index
    %3 = vector.load %arg2[%c0_5, %c0_6] : memref<16x32xbf16, #tpu.memory_space<vmem>>, vector<16x32xbf16>
    %cst = arith.constant dense<0.000000e+00> : vector<16x32xf32>
    %4 = tpu.matmul %2, %3, %cst {dimension_numbers = #tpu.dot_dimension_numbers<[1], [0], [0], [1], [0, 0, 1, 1], [], []>} : vector<16x16xbf16>, vector<16x32xbf16>, vector<16x32xf32> -> vector<16x32xf32>
    %5 = vector.broadcast %0 : vector<1x32xf32> to vector<16x32xf32>
    %6 = arith.addf %4, %5 : vector<16x32xf32>
    %cst_7 = arith.constant 0.000000e+00 : f32
    %7 = vector.broadcast %cst_7 : f32 to vector<16x32xf32>
    %8 = arith.maximumf %6, %7 : vector<16x32xf32>
    %9 = arith.truncf %8 : vector<16x32xf32> to vector<16x32xbf16>
    %c0_8 = arith.constant 0 : index
    %c0_9 = arith.constant 0 : index
    %10 = vector.load %arg4[%c0_8, %c0_9] : memref<32x8xbf16, #tpu.memory_space<vmem>>, vector<32x8xbf16>
    %cst_10 = arith.constant dense<0.000000e+00> : vector<16x8xf32>
    %11 = tpu.matmul %9, %10, %cst_10 {dimension_numbers = #tpu.dot_dimension_numbers<[1], [0], [0], [1], [0, 0, 1, 1], [], []>} : vector<16x32xbf16>, vector<32x8xbf16>, vector<16x8xf32> -> vector<16x8xf32>
    %12 = vector.broadcast %1 : vector<1x8xf32> to vector<16x8xf32>
    %13 = arith.addf %11, %12 : vector<16x8xf32>
    %14 = arith.truncf %13 : vector<16x8xf32> to vector<16x8xbf16>
    %c0_11 = arith.constant 0 : index
    %c0_12 = arith.constant 0 : index
    %15 = vector.load %arg6[%c0_11, %c0_12] : memref<16x8xbf16, #tpu.memory_space<vmem>>, vector<16x8xbf16>
    tpu.vector_store %arg6[%c0_11, %c0_12], %14 {strides = array<i32>} : memref<16x8xbf16, #tpu.memory_space<vmem>>, vector<16x8xbf16>,
    return
  }
  func.func @transform_0(%arg0: i32) -> (i32, i32) {
    %c0_i32 = arith.constant 0 : i32
    %c0_i32_0 = arith.constant 0 : i32
    return %arg0, %c0_i32 : i32, i32
  }
  func.func @transform_1(%arg0: i32) -> (i32, i32) {
    %c0_i32 = arith.constant 0 : i32
    %c0_i32_0 = arith.constant 0 : i32
    %c0_i32_1 = arith.constant 0 : i32
    return %c0_i32, %c0_i32_0 : i32, i32
  }
  func.func @transform_2(%arg0: i32) -> (i32, i32) {
    %c0_i32 = arith.constant 0 : i32
    %c0_i32_0 = arith.constant 0 : i32
    %c0_i32_1 = arith.constant 0 : i32
    return %c0_i32, %c0_i32_0 : i32, i32
  }
  func.func @transform_3(%arg0: i32) -> (i32, i32) {
    %c0_i32 = arith.constant 0 : i32
    %c0_i32_0 = arith.constant 0 : i32
    %c0_i32_1 = arith.constant 0 : i32
    return %c0_i32, %c0_i32_0 : i32, i32
  }
  func.func @transform_4(%arg0: i32) -> (i32, i32) {
    %c0_i32 = arith.constant 0 : i32
    %c0_i32_0 = arith.constant 0 : i32
    %c0_i32_1 = arith.constant 0 : i32
    return %c0_i32, %c0_i32_0 : i32, i32
  }
  func.func @transform_5(%arg0: i32) -> (i32, i32) {
    %c0_i32 = arith.constant 0 : i32
    %c0_i32_0 = arith.constant 0 : i32
    return %arg0, %c0_i32 : i32, i32
  }
}

</mosaic_0001>

<bundles_post_ra>
// kernel: tpu_custom_call.1
= control target key start
LH: loop header
LB: loop body
LE: loop exit
PB: predicated region body
PF: predicated region fallthrough
CT: control target
= control target key end

     0   :  { %v211_v0 = vmov 0.0   ;;  %vm212_vm0 = vmmov 0   ;;  %vm44_vm1 = vcmask 130048   ;;  %vm114_vm2 = vcmask 261120   ;;  %s267_s1 = inlined_call_operand.vmem [shape: bf16[16,32], index: 1, kind: input, shape index: {}]   ;;  %s268_s0 = inlined_call_operand.vmem [shape: bf16[16,16], index: 0, kind: input, shape index: {}]   ;;  %s269_s3 = inlined_call_operand.vmem [shape: bf16[32,8], index: 3, kind: input, shape index: {}]   ;;  %s270_s2 = inlined_call_operand.vmem [shape: f32[1,32], index: 2, kind: input, shape index: {}]   ;;  %s271_s4 = inlined_call_operand.vmem [shape: f32[1,8], index: 4, kind: input, shape index: {}]   ;;  %s272_s5 = inlined_call_operand.vmem [shape: bf16[16,8], index: 5, kind: output, shape index: {}]  }
   0x1   :  { %191 = vmatprep.subr.bf16.mxu0 %v211_v0  ;;  %v207_v1 = vld [vmem:[%s267_s1] sm:$0xff]   ;;  %193 = vmatprep.mubr.msk.bf16.mxu0 %vm212_vm0, %v211_v0  ;;  %v209_v3 = vld [vmem:[%s269_s3 + $0x8] sm:$0xff]   ;;  %vm167_vm3 = vcmask 60416  }
   0x2   :  { %v208_v2 = vld [vmem:[%s268_s0] sm:$0xff]   ;;  %197 = vmatprep.subr.bf16.mxu1 %v211_v0  ;;  %201 = vmatprep.mubr.msk.bf16.mxu1 %vm212_vm0, %v211_v0 }
   0x3   :  { %192 = vmatpush3.bf16.msra.mxu0 %v207_v1  ;;  %198 = vmatpush3.bf16.msra.mxu1 %v209_v3  ;;  %v210_v4 = vld [vmem:[%s269_s3] sm:$0xff]  }
   0x4   :  { %199 = vmatprep.subr.bf16.mxu1 %v211_v0  ;;  %v174_v5 = vld [vmem:[%s270_s2] ss:$0 sm:$0xff] }
   0x5   :  { %v178_v15 = vld [vmem:[%s271_s4] ss:$0 sm:$0xff] }
   0x6   :  { %194 = vmatmul.mubr.msk.bf16.vlgmr.msra.gmra.mxu0 %vm44_vm1, %v208_v2 }
   0x7   :  { %200 = vmatpush3.bf16.msra.mxu1 %v210_v4 }
  0xc6   :  { %v82_v6 = vpop.f32.mrf.mxu0 }
  0xc7   :  { %v83_v8 = vadd.f32 %v174_v5, %v82_v6 }
  0xc8   :  { %v195_v7 = vpop.f32.mrf.mxu0 }
  0xc9   :  { %v89_v12 = vmax.f32 %v83_v8, 0.0 }
  0xca   :  { %v85_v9 = vpop.f32.mrf.mxu0 }
  0xcb   :  { %v86_v10 = vadd.f32 %v174_v5, %v85_v9 }
  0xcc   :  { %v196_v11 = vpop.f32.mrf.mxu0 }
  0xcd   :  { %v90_v13 = vmax.f32 %v86_v10, 0.0 }
  0xcf   :  { %v91_v14 = vpack.c.bf16 %v90_v13, %v89_v12 }
  0xd1   :  { %202 = vmatmul.mubr.msk.bf16.vlgmr.msra.gmra.mxu1 %vm114_vm2, %v91_v14 }
 0x191   :  { %v152_v16 = vpop.f32.mrf.mxu1 }
 0x192   :  { %v153_v17 = vadd.f32 %v178_v15, %v152_v16 }
 0x193   :  { %v203_v18 = vpop.f32.mrf.mxu1 }
 0x194   :  { %v184_v19 = vpack.c.bf16 %v153_v17, %v153_v17 }
 0x195   :  { %v155_v20 = vpop.f32.mrf.mxu1 }
 0x196   :  { %168 = vst.msk [vmem:[%s272_s5] sm:$0xf] %vm167_vm3, %v184_v19  ;;  %v156_v21 = vadd.f32 %v178_v15, %v155_v20 }
 0x197   :  { %v204_v22 = vpop.f32.mrf.mxu1 }
 0x198   :  { %v185_v23 = vpack.c.bf16 %v156_v21, %v156_v21 }
 0x19a   :  { %169 = vst.msk [vmem:[%s272_s5 + $0x4] sm:$0xf] %vm167_vm3, %v185_v23 }

</bundles_post_ra>
